<compile_context>
chip_gen: v6e
topology: v6e:2x2x1
jax: 0.10.0
libtpu: 0.0.40
codegen_flags: <defaults>
</compile_context>

<pallas_src>
import functools
import math

import jax
import jax.numpy as jnp
from jax import lax
from jax.experimental import pallas as pl
from jax.experimental.pallas import tpu as pltpu


CHANNELS = 128  # per-group channel count fixed by the reference module


def _gelu(x):
    # exact GELU (torch.nn.GELU default)
    return 0.5 * x * (1.0 + lax.erf(x * (1.0 / math.sqrt(2.0))))


# ------------------------------- kernel -------------------------------------

def eca_kernel(x_ref, w1_ref, b1_ref, lnw_ref, lnb_ref, w2_ref, b2_ref,
               wg_ref, bg_ref, o_ref, *, num_groups):
    C = CHANNELS

    # ---- group average pool: mean over the G lane-aligned 128-wide slices ---
    # Slices are read from the ref (not a materialized full-tile value) and
    # accumulated in f32.
    gap = x_ref[:, 0:C].astype(jnp.float32)
    for g in range(1, num_groups):                          # static unroll
        gap = gap + x_ref[:, g * C:(g + 1) * C].astype(jnp.float32)
    gap = gap * (1.0 / num_groups)                          # [TILE_B, 128]

    # ---- group_fc: Linear(128->hid) -> LayerNorm -> GELU -> Linear(hid->128) -> Sigmoid
    h = jnp.dot(gap, w1_ref[...].astype(jnp.float32),
                preferred_element_type=jnp.float32) + b1_ref[...]
    mu = jnp.mean(h, axis=-1, keepdims=True)
    var = jnp.mean((h - mu) ** 2, axis=-1, keepdims=True)
    h = (h - mu) * lax.rsqrt(var + 1e-5) * lnw_ref[...] + lnb_ref[...]
    h = _gelu(h)
    group_w = jax.nn.sigmoid(
        jnp.dot(h, w2_ref[...].astype(jnp.float32),
                preferred_element_type=jnp.float32) + b2_ref[...])

    # ---- global_fc: one [TILE_B, G*128] x [G*128, 128] MXU matmul + Sigmoid --
    global_w = jax.nn.sigmoid(
        jnp.dot(x_ref[...], wg_ref[...],
                preferred_element_type=jnp.float32) + bg_ref[...])

    combined = group_w * 0.7 + global_w * 0.3               # [TILE_B, 128] f32

    # ---- scale each group by the combined weights (lane-aligned stores) -----
    # Re-read the 128-wide slices from the ref so loads stream next to stores.
    for g in range(num_groups):
        sl = slice(g * C, (g + 1) * C)
        o_ref[:, sl] = (x_ref[:, sl].astype(jnp.float32) * combined).astype(o_ref.dtype)


# ------------------------------- wrapper -------------------------------------

def enhanced_channel_attention(x, params, num_groups, *, tile_b=512):
    B, D = x.shape
    assert D == num_groups * CHANNELS
    dtype = x.dtype
    itemsize = jnp.dtype(dtype).itemsize

    weights = (params["w1"], params["b1"], params["lnw"], params["lnb"],
               params["w2"], params["b2"], params["wg"], params["bg"])

    # ---- batch tiling (pad ragged batch; per-row math so padding is benign) --
    if B <= tile_b:
        tile_b = B
        b_pad = B
    else:
        b_pad = pl.cdiv(B, tile_b) * tile_b
    x_p = x if b_pad == B else jnp.pad(x, ((0, b_pad - B), (0, 0)))
    grid = (b_pad // tile_b,)

    # ---- specs: x/out pipelined over the batch grid, weights grid-invariant --
    x_spec = pl.BlockSpec((tile_b, D), lambda i: (i, 0))
    w_specs = [pl.BlockSpec(w.shape, lambda i: (0, 0)) for w in weights]
    out_spec = pl.BlockSpec((tile_b, D), lambda i: (i, 0))

    # ---- VMEM budget: double-buffered in/out tiles + resident weights --------
    weight_bytes = sum(int(w.size) * w.dtype.itemsize for w in weights)
    tile_bytes = tile_b * D * itemsize
    vmem_needed = 4 * tile_bytes + 2 * weight_bytes          # 2-deep in + out
    vmem_limit = int(min(max(2 * vmem_needed, 16 * 1024 * 1024),
                         64 * 1024 * 1024))

    # ---- advisory cost estimate (memory-bound custom call) -------------------
    hid = params["w1"].shape[1]
    flops = (2 * b_pad * D * CHANNELS            # global fc
             + 2 * b_pad * CHANNELS * hid        # group fc #1
             + 2 * b_pad * hid * CHANNELS        # group fc #2
             + 4 * b_pad * D)                    # mean + scale
    transcendentals = b_pad * (2 * CHANNELS + hid)
    bytes_accessed = 2 * b_pad * D * itemsize + weight_bytes
    cost = pl.CostEstimate(flops=flops, transcendentals=transcendentals,
                           bytes_accessed=bytes_accessed)

    out = pl.pallas_call(
        functools.partial(eca_kernel, num_groups=num_groups),
        out_shape=jax.ShapeDtypeStruct((b_pad, D), dtype),
        grid=grid,
        in_specs=[x_spec] + w_specs,
        out_specs=out_spec,
        input_output_aliases={0: 0},             # donate x's HBM buffer
        compiler_params=pltpu.CompilerParams(
            dimension_semantics=("parallel",),
            vmem_limit_bytes=vmem_limit),
        cost_estimate=cost,
    )(x_p, *weights)

    return out if b_pad == B else out[:B]


# ------------------------------ reference ------------------------------------

def reference_forward(x, params, num_groups):
    B, D = x.shape
    xg = x.reshape(B, num_groups, CHANNELS)
    gap = xg.mean(axis=1)
    h = gap @ params["w1"] + params["b1"]
    mu = h.mean(-1, keepdims=True)
    var = ((h - mu) ** 2).mean(-1, keepdims=True)
    h = (h - mu) / jnp.sqrt(var + 1e-5) * params["lnw"] + params["lnb"]
    h = 0.5 * h * (1.0 + lax.erf(h / jnp.sqrt(2.0)))
    group_w = jax.nn.sigmoid(h @ params["w2"] + params["b2"])
    global_w = jax.nn.sigmoid(x @ params["wg"] + params["bg"])
    combined = group_w * 0.7 + global_w * 0.3
    return (xg * combined[:, None, :]).reshape(B, D)


# --------------------------- parameter init ----------------------------------

def init_params(key, num_groups, ratio=16):
    C = CHANNELS
    hid = C // ratio
    ks = jax.random.split(key, 3)

    def lin(k, fan_in, fan_out):
        bound = 1.0 / math.sqrt(fan_in)
        kw, kb = jax.random.split(k)
        w = jax.random.uniform(kw, (fan_in, fan_out), jnp.float32, -bound, bound)
        b = jax.random.uniform(kb, (1, fan_out), jnp.float32, -bound, bound)
        return w, b

    w1, b1 = lin(ks[0], C, hid)
    w2, b2 = lin(ks[1], hid, C)
    wg, bg = lin(ks[2], C * num_groups, C)
    return dict(
        w1=w1, b1=b1,
        lnw=jnp.ones((1, hid), jnp.float32),
        lnb=jnp.zeros((1, hid), jnp.float32),
        w2=w2, b2=b2, wg=wg, bg=bg,
    )


# --------------------------------- main ---------------------------------------

if __name__ == "__main__":
    key = jax.random.PRNGKey(0)
    kx, kp, kx2 = jax.random.split(key, 3)

    # Small demo matching the module spec: x = [B, G*128] with B=2, G=4.
    B, num_groups = 2, 4
    x = jax.random.normal(kx, (B, num_groups * CHANNELS), jnp.float32)
    params = init_params(kp, num_groups)

    ref = reference_forward(x, params, num_groups)
    out = jax.block_until_ready(enhanced_channel_attention(x, params, num_groups))
    assert out.shape == (B, num_groups * CHANNELS), out.shape
    assert bool(jnp.all(jnp.isfinite(out)))
    assert bool(jnp.allclose(out, ref, atol=1e-4, rtol=1e-4)), \
        float(jnp.max(jnp.abs(out - ref)))

    # Second tiny check exercising the batch grid + ragged-tile padding path.
    B2 = 20
    x2 = jax.random.normal(kx2, (B2, num_groups * CHANNELS), jnp.float32)
    ref2 = reference_forward(x2, params, num_groups)
    out2 = jax.block_until_ready(
        enhanced_channel_attention(x2, params, num_groups, tile_b=8))
    assert out2.shape == (B2, num_groups * CHANNELS), out2.shape
    assert bool(jnp.allclose(out2, ref2, atol=1e-4, rtol=1e-4)), \
        float(jnp.max(jnp.abs(out2 - ref2)))

    print("KERNEL_OK")
</pallas_src>

<mosaic_0001>
module attributes {stable_mosaic.version = 11 : i64} {
  func.func @eca_kernel(%arg0: i32, %arg1: memref<2x512xf32, #tpu.memory_space<vmem>>, %arg2: memref<128x8xf32, #tpu.memory_space<vmem>>, %arg3: memref<1x8xf32, #tpu.memory_space<vmem>>, %arg4: memref<1x8xf32, #tpu.memory_space<vmem>>, %arg5: memref<1x8xf32, #tpu.memory_space<vmem>>, %arg6: memref<8x128xf32, #tpu.memory_space<vmem>>, %arg7: memref<1x128xf32, #tpu.memory_space<vmem>>, %arg8: memref<512x128xf32, #tpu.memory_space<vmem>>, %arg9: memref<1x128xf32, #tpu.memory_space<vmem>>, %arg10: memref<2x512xf32, #tpu.memory_space<vmem>>) attributes {dimension_semantics = [#tpu.dimension_semantics<parallel>], iteration_bounds = array<i64: 1>, scalar_prefetch = 0 : i64, scratch_operands = 0 : i64, tpu.core_type = #tpu.core_type<tc>, window_params = [{transform_indices = @transform_0, window_bounds = array<i64: 2, 512>}, {pipeline_mode = #tpu.pipeline_mode<synchronous>, transform_indices = @transform_1, window_bounds = array<i64: 128, 8>}, {pipeline_mode = #tpu.pipeline_mode<synchronous>, transform_indices = @transform_2, window_bounds = array<i64: 1, 8>}, {pipeline_mode = #tpu.pipeline_mode<synchronous>, transform_indices = @transform_3, window_bounds = array<i64: 1, 8>}, {pipeline_mode = #tpu.pipeline_mode<synchronous>, transform_indices = @transform_4, window_bounds = array<i64: 1, 8>}, {pipeline_mode = #tpu.pipeline_mode<synchronous>, transform_indices = @transform_5, window_bounds = array<i64: 8, 128>}, {pipeline_mode = #tpu.pipeline_mode<synchronous>, transform_indices = @transform_6, window_bounds = array<i64: 1, 128>}, {pipeline_mode = #tpu.pipeline_mode<synchronous>, transform_indices = @transform_7, window_bounds = array<i64: 512, 128>}, {pipeline_mode = #tpu.pipeline_mode<synchronous>, transform_indices = @transform_8, window_bounds = array<i64: 1, 128>}, {transform_indices = @transform_9, window_bounds = array<i64: 2, 512>}]} {
    %c0 = arith.constant 0 : index
    %c0_0 = arith.constant 0 : index
    %0 = vector.load %arg1[%c0, %c0_0] : memref<2x512xf32, #tpu.memory_space<vmem>>, vector<2x128xf32>
    %c0_1 = arith.constant 0 : index
    %c128 = arith.constant 128 : index
    %1 = vector.load %arg1[%c0_1, %c128] : memref<2x512xf32, #tpu.memory_space<vmem>>, vector<2x128xf32>
    %2 = arith.addf %0, %1 : vector<2x128xf32>
    %c0_2 = arith.constant 0 : index
    %c256 = arith.constant 256 : index
    %3 = vector.load %arg1[%c0_2, %c256] : memref<2x512xf32, #tpu.memory_space<vmem>>, vector<2x128xf32>
    %4 = arith.addf %2, %3 : vector<2x128xf32>
    %c0_3 = arith.constant 0 : index
    %c384 = arith.constant 384 : index
    %5 = vector.load %arg1[%c0_3, %c384] : memref<2x512xf32, #tpu.memory_space<vmem>>, vector<2x128xf32>
    %6 = arith.addf %4, %5 : vector<2x128xf32>
    %cst = arith.constant 2.500000e-01 : f32
    %7 = vector.broadcast %cst : f32 to vector<2x128xf32>
    %8 = arith.mulf %6, %7 : vector<2x128xf32>
    %c0_4 = arith.constant 0 : index
    %c0_5 = arith.constant 0 : index
    %9 = vector.load %arg2[%c0_4, %c0_5] : memref<128x8xf32, #tpu.memory_space<vmem>>, vector<128x8xf32>
    %cst_6 = arith.constant dense<0.000000e+00> : vector<2x8xf32>
    %10 = tpu.matmul %8, %9, %cst_6 {dimension_numbers = #tpu.dot_dimension_numbers<[1], [0], [0], [1], [0, 0, 1, 1], [], []>} : vector<2x128xf32>, vector<128x8xf32>, vector<2x8xf32> -> vector<2x8xf32>
    %c0_7 = arith.constant 0 : index
    %c0_8 = arith.constant 0 : index
    %11 = vector.load %arg3[%c0_7, %c0_8] : memref<1x8xf32, #tpu.memory_space<vmem>>, vector<1x8xf32>
    %12 = vector.broadcast %11 : vector<1x8xf32> to vector<2x8xf32>
    %13 = arith.addf %10, %12 : vector<2x8xf32>
    %cst_9 = arith.constant dense<0.000000e+00> : vector<2xf32>
    %14 = vector.multi_reduction <add>, %13, %cst_9 [1] : vector<2x8xf32> to vector<2xf32>
    %15 = vector.shape_cast %14 : vector<2xf32> to vector<2x1xf32>
    %cst_10 = arith.constant 8.000000e+00 : f32
    %16 = vector.broadcast %cst_10 : f32 to vector<2x1xf32>
    %17 = arith.divf %15, %16 : vector<2x1xf32>
    %18 = vector.broadcast %17 : vector<2x1xf32> to vector<2x8xf32>
    %19 = arith.subf %13, %18 : vector<2x8xf32>
    %20 = arith.mulf %19, %19 : vector<2x8xf32>
    %cst_11 = arith.constant dense<0.000000e+00> : vector<2xf32>
    %21 = vector.multi_reduction <add>, %20, %cst_11 [1] : vector<2x8xf32> to vector<2xf32>
    %22 = vector.shape_cast %21 : vector<2xf32> to vector<2x1xf32>
    %cst_12 = arith.constant 8.000000e+00 : f32
    %23 = vector.broadcast %cst_12 : f32 to vector<2x1xf32>
    %24 = arith.divf %22, %23 : vector<2x1xf32>
    %25 = vector.broadcast %17 : vector<2x1xf32> to vector<2x8xf32>
    %26 = arith.subf %13, %25 : vector<2x8xf32>
    %cst_13 = arith.constant 9.99999974E-6 : f32
    %27 = vector.broadcast %cst_13 : f32 to vector<2x1xf32>
    %28 = arith.addf %24, %27 : vector<2x1xf32>
    %29 = math.rsqrt %28 : vector<2x1xf32>
    %30 = vector.broadcast %29 : vector<2x1xf32> to vector<2x8xf32>
    %31 = arith.mulf %26, %30 : vector<2x8xf32>
    %c0_14 = arith.constant 0 : index
    %c0_15 = arith.constant 0 : index
    %32 = vector.load %arg4[%c0_14, %c0_15] : memref<1x8xf32, #tpu.memory_space<vmem>>, vector<1x8xf32>
    %33 = vector.broadcast %32 : vector<1x8xf32> to vector<2x8xf32>
    %34 = arith.mulf %31, %33 : vector<2x8xf32>
    %c0_16 = arith.constant 0 : index
    %c0_17 = arith.constant 0 : index
    %35 = vector.load %arg5[%c0_16, %c0_17] : memref<1x8xf32, #tpu.memory_space<vmem>>, vector<1x8xf32>
    %36 = vector.broadcast %35 : vector<1x8xf32> to vector<2x8xf32>
    %37 = arith.addf %34, %36 : vector<2x8xf32>
    %cst_18 = arith.constant 5.000000e-01 : f32
    %38 = vector.broadcast %cst_18 : f32 to vector<2x8xf32>
    %39 = arith.mulf %38, %37 : vector<2x8xf32>
    %cst_19 = arith.constant 0.707106769 : f32
    %40 = vector.broadcast %cst_19 : f32 to vector<2x8xf32>
    %41 = arith.mulf %37, %40 : vector<2x8xf32>
    %42 = math.erf %41 : vector<2x8xf32>
    %cst_20 = arith.constant 1.000000e+00 : f32
    %43 = vector.broadcast %cst_20 : f32 to vector<2x8xf32>
    %44 = arith.addf %43, %42 : vector<2x8xf32>
    %45 = arith.mulf %39, %44 : vector<2x8xf32>
    %c0_21 = arith.constant 0 : index
    %c0_22 = arith.constant 0 : index
    %46 = vector.load %arg6[%c0_21, %c0_22] : memref<8x128xf32, #tpu.memory_space<vmem>>, vector<8x128xf32>
    %cst_23 = arith.constant dense<0.000000e+00> : vector<2x128xf32>
    %47 = tpu.matmul %45, %46, %cst_23 {dimension_numbers = #tpu.dot_dimension_numbers<[1], [0], [0], [1], [0, 0, 1, 1], [], []>} : vector<2x8xf32>, vector<8x128xf32>, vector<2x128xf32> -> vector<2x128xf32>
    %c0_24 = arith.constant 0 : index
    %c0_25 = arith.constant 0 : index
    %48 = vector.load %arg7[%c0_24, %c0_25] : memref<1x128xf32, #tpu.memory_space<vmem>>, vector<1x128xf32>
    %49 = vector.broadcast %48 : vector<1x128xf32> to vector<2x128xf32>
    %50 = arith.addf %47, %49 : vector<2x128xf32>
    %51 = arith.negf %50 : vector<2x128xf32>
    %52 = math.exp %51 : vector<2x128xf32>
    %cst_26 = arith.constant 1.000000e+00 : f32
    %53 = vector.broadcast %cst_26 : f32 to vector<2x128xf32>
    %54 = arith.addf %53, %52 : vector<2x128xf32>
    %55 = arith.divf %53, %54 : vector<2x128xf32>
    %c0_27 = arith.constant 0 : index
    %c0_28 = arith.constant 0 : index
    %56 = vector.load %arg1[%c0_27, %c0_28] : memref<2x512xf32, #tpu.memory_space<vmem>>, vector<2x512xf32>
    %c0_29 = arith.constant 0 : index
    %c0_30 = arith.constant 0 : index
    %57 = vector.load %arg8[%c0_29, %c0_30] : memref<512x128xf32, #tpu.memory_space<vmem>>, vector<512x128xf32>
    %cst_31 = arith.constant dense<0.000000e+00> : vector<2x128xf32>
    %58 = tpu.matmul %56, %57, %cst_31 {dimension_numbers = #tpu.dot_dimension_numbers<[1], [0], [0], [1], [0, 0, 1, 1], [], []>} : vector<2x512xf32>, vector<512x128xf32>, vector<2x128xf32> -> vector<2x128xf32>
    %c0_32 = arith.constant 0 : index
    %c0_33 = arith.constant 0 : index
    %59 = vector.load %arg9[%c0_32, %c0_33] : memref<1x128xf32, #tpu.memory_space<vmem>>, vector<1x128xf32>
    %60 = vector.broadcast %59 : vector<1x128xf32> to vector<2x128xf32>
    %61 = arith.addf %58, %60 : vector<2x128xf32>
    %62 = arith.negf %61 : vector<2x128xf32>
    %63 = math.exp %62 : vector<2x128xf32>
    %cst_34 = arith.constant 1.000000e+00 : f32
    %64 = vector.broadcast %cst_34 : f32 to vector<2x128xf32>
    %65 = arith.addf %64, %63 : vector<2x128xf32>
    %66 = arith.divf %64, %65 : vector<2x128xf32>
    %cst_35 = arith.constant 0.699999988 : f32
    %67 = vector.broadcast %cst_35 : f32 to vector<2x128xf32>
    %68 = arith.mulf %55, %67 : vector<2x128xf32>
    %cst_36 = arith.constant 3.000000e-01 : f32
    %69 = vector.broadcast %cst_36 : f32 to vector<2x128xf32>
    %70 = arith.mulf %66, %69 : vector<2x128xf32>
    %71 = arith.addf %68, %70 : vector<2x128xf32>
    %c0_37 = arith.constant 0 : index
    %c0_38 = arith.constant 0 : index
    %72 = vector.load %arg1[%c0_37, %c0_38] : memref<2x512xf32, #tpu.memory_space<vmem>>, vector<2x128xf32>
    %73 = arith.mulf %72, %71 : vector<2x128xf32>
    %c0_39 = arith.constant 0 : index
    %c0_40 = arith.constant 0 : index
    %74 = vector.load %arg10[%c0_39, %c0_40] : memref<2x512xf32, #tpu.memory_space<vmem>>, vector<2x128xf32>
    tpu.vector_store %arg10[%c0_39, %c0_40], %73 {strides = array<i32>} : memref<2x512xf32, #tpu.memory_space<vmem>>, vector<2x128xf32>,
    %c0_41 = arith.constant 0 : index
    %c128_42 = arith.constant 128 : index
    %75 = vector.load %arg1[%c0_41, %c128_42] : memref<2x512xf32, #tpu.memory_space<vmem>>, vector<2x128xf32>
    %76 = arith.mulf %75, %71 : vector<2x128xf32>
    %c0_43 = arith.constant 0 : index
    %c128_44 = arith.constant 128 : index
    %77 = vector.load %arg10[%c0_43, %c128_44] : memref<2x512xf32, #tpu.memory_space<vmem>>, vector<2x128xf32>
    tpu.vector_store %arg10[%c0_43, %c128_44], %76 {strides = array<i32>} : memref<2x512xf32, #tpu.memory_space<vmem>>, vector<2x128xf32>,
    %c0_45 = arith.constant 0 : index
    %c256_46 = arith.constant 256 : index
    %78 = vector.load %arg1[%c0_45, %c256_46] : memref<2x512xf32, #tpu.memory_space<vmem>>, vector<2x128xf32>
    %79 = arith.mulf %78, %71 : vector<2x128xf32>
    %c0_47 = arith.constant 0 : index
    %c256_48 = arith.constant 256 : index
    %80 = vector.load %arg10[%c0_47, %c256_48] : memref<2x512xf32, #tpu.memory_space<vmem>>, vector<2x128xf32>
    tpu.vector_store %arg10[%c0_47, %c256_48], %79 {strides = array<i32>} : memref<2x512xf32, #tpu.memory_space<vmem>>, vector<2x128xf32>,
    %c0_49 = arith.constant 0 : index
    %c384_50 = arith.constant 384 : index
    %81 = vector.load %arg1[%c0_49, %c384_50] : memref<2x512xf32, #tpu.memory_space<vmem>>, vector<2x128xf32>
    %82 = arith.mulf %81, %71 : vector<2x128xf32>
    %c0_51 = arith.constant 0 : index
    %c384_52 = arith.constant 384 : index
    %83 = vector.load %arg10[%c0_51, %c384_52] : memref<2x512xf32, #tpu.memory_space<vmem>>, vector<2x128xf32>
    tpu.vector_store %arg10[%c0_51, %c384_52], %82 {strides = array<i32>} : memref<2x512xf32, #tpu.memory_space<vmem>>, vector<2x128xf32>,
    return
  }
  func.func @transform_0(%arg0: i32) -> (i32, i32) {
    %c0_i32 = arith.constant 0 : i32
    %c0_i32_0 = arith.constant 0 : i32
    return %arg0, %c0_i32 : i32, i32
  }
  func.func @transform_1(%arg0: i32) -> (i32, i32) {
    %c0_i32 = arith.constant 0 : i32
    %c0_i32_0 = arith.constant 0 : i32
    %c0_i32_1 = arith.constant 0 : i32
    return %c0_i32, %c0_i32_0 : i32, i32
  }
  func.func @transform_2(%arg0: i32) -> (i32, i32) {
    %c0_i32 = arith.constant 0 : i32
    %c0_i32_0 = arith.constant 0 : i32
    %c0_i32_1 = arith.constant 0 : i32
    return %c0_i32, %c0_i32_0 : i32, i32
  }
  func.func @transform_3(%arg0: i32) -> (i32, i32) {
    %c0_i32 = arith.constant 0 : i32
    %c0_i32_0 = arith.constant 0 : i32
    %c0_i32_1 = arith.constant 0 : i32
    return %c0_i32, %c0_i32_0 : i32, i32
  }
  func.func @transform_4(%arg0: i32) -> (i32, i32) {
    %c0_i32 = arith.constant 0 : i32
    %c0_i32_0 = arith.constant 0 : i32
    %c0_i32_1 = arith.constant 0 : i32
    return %c0_i32, %c0_i32_0 : i32, i32
  }
  func.func @transform_5(%arg0: i32) -> (i32, i32) {
    %c0_i32 = arith.constant 0 : i32
    %c0_i32_0 = arith.constant 0 : i32
    %c0_i32_1 = arith.constant 0 : i32
    return %c0_i32, %c0_i32_0 : i32, i32
  }
  func.func @transform_6(%arg0: i32) -> (i32, i32) {
    %c0_i32 = arith.constant 0 : i32
    %c0_i32_0 = arith.constant 0 : i32
    %c0_i32_1 = arith.constant 0 : i32
    return %c0_i32, %c0_i32_0 : i32, i32
  }
  func.func @transform_7(%arg0: i32) -> (i32, i32) {
    %c0_i32 = arith.constant 0 : i32
    %c0_i32_0 = arith.constant 0 : i32
    %c0_i32_1 = arith.constant 0 : i32
    return %c0_i32, %c0_i32_0 : i32, i32
  }
  func.func @transform_8(%arg0: i32) -> (i32, i32) {
    %c0_i32 = arith.constant 0 : i32
    %c0_i32_0 = arith.constant 0 : i32
    %c0_i32_1 = arith.constant 0 : i32
    return %c0_i32, %c0_i32_0 : i32, i32
  }
  func.func @transform_9(%arg0: i32) -> (i32, i32) {
    %c0_i32 = arith.constant 0 : i32
    %c0_i32_0 = arith.constant 0 : i32
    return %arg0, %c0_i32 : i32, i32
  }
}

</mosaic_0001>

<bundles_post_ra>
// kernel: tpu_custom_call.1
= control target key start
LH: loop header
LB: loop body
LE: loop exit
PB: predicated region body
PF: predicated region fallthrough
CT: control target
= control target key end

     0   :  { %14 = vsyncpa [#allocation3], 0  ;;  %s925_s0 = inlined_call_operand.hbm [shape: f32[2,512], index: 0, kind: input, shape index: {}, may-alias: {0,9}]   ;;  %s926_s1 = inlined_call_operand.vmem [shape: f32[128,8], index: 1, kind: input, shape index: {}]   ;;  %s927_s2 = inlined_call_operand.vmem [shape: f32[1,8], index: 2, kind: input, shape index: {}]   ;;  %s928_s3 = inlined_call_operand.vmem [shape: f32[1,8], index: 3, kind: input, shape index: {}]   ;;  %s929_s4 = inlined_call_operand.vmem [shape: f32[1,8], index: 4, kind: input, shape index: {}]   ;;  %s930_s5 = inlined_call_operand.vmem [shape: f32[8,128], index: 5, kind: input, shape index: {}]   ;;  %s931_s6 = inlined_call_operand.vmem [shape: f32[1,128], index: 6, kind: input, shape index: {}]   ;;  %s932_s7 = inlined_call_operand.hbm [shape: f32[512,128], index: 7, kind: input, shape index: {}]   ;;  %s933_s8 = inlined_call_operand.vmem [shape: f32[1,128], index: 8, kind: input, shape index: {}]   ;;  %s934_s9 = inlined_call_operand.hbm [shape: f32[2,512], index: 9, kind: output, shape index: {}, may-alias: {0,9}]  }
   0x1   :  { %15 = vsyncpa [#allocation6], 0 }
   0x2   :  { %16 = vsyncpa [#allocation4], 0  ;;  %s778_s30 = smov [#allocation2]   ;;  %s779_s11 = smov [#allocation5]  }
   0x3   :  { %s23_s10 = sshll.u32 %s778_s30, 4  ;;  %s44_s12 = sshll.u32 %s779_s11, 4  ;;  %s24_s10 = int_to_ptr.vmem [resolvable:$true] %s23_s10  ;;  %s45_s12 = int_to_ptr.vmem [resolvable:$true] %s44_s12 }
   0x4   :  { %s720_s13 = scalar_lea.vmem %s24_s10, 128  ;;  %p725_p1 = scmp.lt.s32.totalorder %s24_s10, %s24_s10 }
   0x5   :  { %p721_p0 = scmp.ne.s32.totalorder %s24_s10, %s720_s13  ;;  %p726_p2 = scmp.lt.s32.totalorder %s720_s13, %s720_s13 }
   0x7   :  { %p727_p3 = por %p726_p2, %p725_p1 }
   0x9   :  { %p728_p4 = pnand %p727_p3, %p721_p0 }
   0xb   :  { %731 = shalt.err (!%p728_p4)
}
   0xc   :  { %26 = dma.hbm_to_vmem [thread:$0]  %s925_s0, 128, %s24_s10, [#allocation3]  }
   0xd   :  { %s740_s16 = scalar_lea.vmem %s45_s12, 8192  ;;  %p745_p6 = scmp.lt.s32.totalorder %s45_s12, %s45_s12 }
   0xe   :  { %p741_p5 = scmp.ne.s32.totalorder %s45_s12, %s740_s16  ;;  %p746_p7 = scmp.lt.s32.totalorder %s740_s16, %s740_s16 }
  0x10   :  { %p747_p8 = por %p746_p7, %p745_p6 }
  0x12   :  { %p748_p9 = pnand %p747_p8, %p741_p5 }
  0x14   :  { %751 = shalt.err (!%p748_p9)
}
  0x15   :  { %s780_s17 = smov 128   ;;  %s781_s18 = smov 8  }
  0x16   :  { %50 = dma.hbm_to_vmem [thread:$0]  %s932_s7, 8192, %s45_s12, [#allocation6], %s780_s17, %s780_s17, %s781_s18  }
  0x17   :  { %772 = dma.done.wait [#allocation3], 128  }
  0x18   :  { %773 = vsyncadd [#allocation3], 4294967168 }
  0x19   :  { %774 = dma.done.wait [#allocation6], 8192  }
  0x1a   :  { %775 = vsyncadd [#allocation6], 4294959104  ;;  %v782_v0 = vmov 0.0   ;;  %vm783_vm0 = vmmov 0   ;;  %v82_v1 = vld [vmem:[%s926_s1 + $0x78] sm:$0xff]  ;;  %v81_v2 = vld [vmem:[%s926_s1 + $0x70] sm:$0xff]  ;;  %v361_v62 = vlaneseq }
  0x1b   :  { %651 = vmatprep.subr.mxu0 %v782_v0  ;;  %683 = vmatprep.mubr.msk.f32.mxu0 %vm783_vm0, %v782_v0  ;;  %v80_v3 = vld [vmem:[%s926_s1 + $0x68] sm:$0xff]  ;;  %v79_v4 = vld [vmem:[%s926_s1 + $0x60] sm:$0xff]  ;;  %v78_v5 = vld [vmem:[%s926_s1 + $0x58] sm:$0xff]  ;;  %vm160_vm1 = vcmask 58368   ;;  %v784_v60 = vmov 1983009808  }
  0x1c   :  { %686 = vmatprep.subr.mxu1 %v782_v0  ;;  %688 = vmatprep.mubr.msk.f32.mxu1 %vm783_vm0, %v782_v0  ;;  %v77_v6 = vld [vmem:[%s926_s1 + $0x50] sm:$0xff]  ;;  %v76_v7 = vld [vmem:[%s926_s1 + $0x48] sm:$0xff]  ;;  %v75_v8 = vld [vmem:[%s926_s1 + $0x40] sm:$0xff]  ;;  %v359_v61 = vunpack.c.l.s4 %v784_v60  ;;  %vm204_vm2 = vcmask 64512  }
  0x1d   :  { %652 = vmatpush3.msra.mxu0 %v82_v1  ;;  %v866_v9 = vld [vmem:[#allocation2] sm:$0x3]  ;;  %v60_v10 = vld [vmem:[#allocation2 + $0x2] sm:$0x3]  ;;  %v74_v11 = vld [vmem:[%s926_s1 + $0x38] sm:$0xff] }
  0x1e   :  { %653 = vmatprep.subr.mxu0 %v782_v0  ;;  %v73_v12 = vld [vmem:[%s926_s1 + $0x30] sm:$0xff]  ;;  %v61_v13 = vadd.f32 %v60_v10, %v866_v9  ;;  %v62_v14 = vld [vmem:[#allocation2 + $0x4] sm:$0x3]  ;;  %v72_v15 = vld [vmem:[%s926_s1 + $0x28] sm:$0xff]  ;;  %v360_v1 = vunpack.c.0.s8 %v359_v61 }
  0x1f   :  { %654 = vmatpush3.msra.mxu0 %v81_v2  ;;  %v71_v16 = vld [vmem:[%s926_s1 + $0x20] sm:$0xff]  ;;  %v70_v19 = vld [vmem:[%s926_s1 + $0x18] sm:$0xff]  ;;  %v69_v20 = vld [vmem:[%s926_s1 + $0x10] sm:$0xff]  ;;  %v362_v2 = vshrl.u32 %v361_v62, 7 }
  0x20   :  { %655 = vmatprep.subr.mxu0 %v782_v0  ;;  %v63_v17 = vadd.f32 %v62_v14, %v61_v13  ;;  %v64_v18 = vld [vmem:[#allocation2 + $0x6] sm:$0x3]  ;;  %v68_v22 = vld [vmem:[%s926_s1 + $0x8] sm:$0xff]  ;;  %v554_v25 = vld [vmem:[%s927_s2] ss:$0 sm:$0xff] }
  0x21   :  { %656 = vmatpush3.msra.mxu0 %v80_v3  ;;  %v67_v23 = vld [vmem:[%s926_s1] sm:$0xff]  ;;  %v347_v39 = vld [vmem:[#allocation5 + $0x1f0] sm:$0xff]  ;;  %v346_v41 = vld [vmem:[#allocation5 + $0x1e8] sm:$0xff] }
  0x22   :  { %657 = vmatprep.subr.mxu0 %v782_v0  ;;  %v65_v21 = vadd.f32 %v64_v18, %v63_v17  ;;  %v196_v35 = vld [vmem:[%s930_s5] sm:$0xff]  ;;  %v331_v40 = vld [vmem:[#allocation5 + $0x170] sm:$0xff]  ;;  %v330_v42 = vld [vmem:[#allocation5 + $0x168] sm:$0xff] }
  0x23   :  { %658 = vmatpush3.msra.mxu0 %v79_v4  ;;  %v316_v36 = vld [vmem:[#allocation5 + $0xf8] sm:$0xff]  ;;  %687 = vmatpush3.msra.mxu1 %v196_v35  ;;  %v345_v43 = vld [vmem:[#allocation5 + $0x1e0] sm:$0xff]  ;;  %v343_v47 = vld [vmem:[#allocation5 + $0x1d0] sm:$0xff] }
  0x24   :  { %659 = vmatprep.subr.mxu0 %v782_v0  ;;  %v66_v24 = vmul.f32 0.25, %v65_v21  ;;  %v348_v37 = vld [vmem:[#allocation5 + $0x1f8] sm:$0xff]  ;;  %581 = vmatprep.subr.mxu1 %v316_v36  ;;  %v329_v44 = vld [vmem:[#allocation5 + $0x160] sm:$0xff]  ;;  %v327_v48 = vld [vmem:[#allocation5 + $0x150] sm:$0xff] }
  0x25   :  { %660 = vmatpush3.msra.mxu0 %v78_v5  ;;  %v332_v38 = vld [vmem:[#allocation5 + $0x178] sm:$0xff]  ;;  %v342_v49 = vld [vmem:[#allocation5 + $0x1c8] sm:$0xff]  ;;  %v341_v51 = vld [vmem:[#allocation5 + $0x1c0] sm:$0xff] }
  0x26   :  { %661 = vmatprep.subr.mxu0 %v782_v0  ;;  %v344_v45 = vld [vmem:[#allocation5 + $0x1d8] sm:$0xff]  ;;  %v326_v50 = vld [vmem:[#allocation5 + $0x148] sm:$0xff]  ;;  %v325_v52 = vld [vmem:[#allocation5 + $0x140] sm:$0xff] }
  0x27   :  { %662 = vmatpush3.msra.mxu0 %v77_v6  ;;  %v328_v46 = vld [vmem:[#allocation5 + $0x158] sm:$0xff]  ;;  %v339_v55 = vld [vmem:[#allocation5 + $0x1b0] sm:$0xff]  ;;  %v338_v57 = vld [vmem:[#allocation5 + $0x1a8] sm:$0xff]  ;;  %v363_v6 = vsub.s32 %v360_v1, %v362_v2 }
  0x28   :  { %663 = vmatprep.subr.mxu0 %v782_v0  ;;  %v340_v53 = vld [vmem:[#allocation5 + $0x1b8] sm:$0xff]  ;;  %v323_v56 = vld [vmem:[#allocation5 + $0x130] sm:$0xff]  ;;  %v322_v58 = vld [vmem:[#allocation5 + $0x128] sm:$0xff] }
  0x29   :  { %664 = vmatpush3.msra.mxu0 %v76_v7  ;;  %v324_v54 = vld [vmem:[#allocation5 + $0x138] sm:$0xff]  ;;  %v337_v59 = vld [vmem:[#allocation5 + $0x1a0] sm:$0xff]  ;;  %v335_v5 = vld [vmem:[#allocation5 + $0x190] sm:$0xff] }
  0x2a   :  { %665 = vmatprep.subr.mxu0 %v782_v0  ;;  %v321_v63 = vld [vmem:[#allocation5 + $0x120] sm:$0xff]  ;;  %v320_v3 = vld [vmem:[#allocation5 + $0x118] sm:$0xff]  ;;  %v334_v10 = vld [vmem:[#allocation5 + $0x188] sm:$0xff] }
  0x2b   :  { %666 = vmatpush3.msra.mxu0 %v75_v8  ;;  %v284_v4 = vld [vmem:[#allocation2] sm:$0xff]  ;;  %v319_v8 = vld [vmem:[#allocation5 + $0x110] sm:$0xff]  ;;  %v318_v13 = vld [vmem:[#allocation5 + $0x108] sm:$0xff] }
  0x2c   :  { %667 = vmatprep.subr.mxu0 %v782_v0  ;;  %v357_v7 = vcombine.high %v284_v4, %v284_v4  ;;  %v333_v14 = vld [vmem:[#allocation5 + $0x180] sm:$0xff]  ;;  %v555_v21 = vld [vmem:[%s928_s3] ss:$0 sm:$0xff]  ;;  %v314_v35 = vld [vmem:[#allocation5 + $0xe8] sm:$0xff] }
  0x2d   :  { %668 = vmatpush3.msra.mxu0 %v74_v11  ;;  %v903_v11 = vrot.slane %v284_v4, %v363_v6  ;;  %v298_v36 = vld [vmem:[#allocation5 + $0x68] sm:$0xff]  ;;  %v301_v61 = vld [vmem:[#allocation5 + $0x80] sm:$0xff]  ;;  %v557_v1 = vld [vmem:[%s931_s6] ss:$0 sm:$0xff]  ;;  %s785_s6 = smov [#allocation7]  }
  0x2e   :  { %669 = vmatprep.subr.mxu0 %v782_v0  ;;  %v286_v60 = vld [vmem:[#allocation5 + $0x8] sm:$0xff]  ;;  %v285_v62 = vld [vmem:[#allocation5] sm:$0xff] }
  0x2f   :  { %670 = vmatpush3.msra.mxu0 %v73_v12  ;;  %v371_v12 = vrot.slane %v357_v7, %v363_v6  ;;  %v560_v6 = vld [vmem:[%s933_s8] ss:$0 sm:$0xff]  ;;  %s544_s8 = sshll.u32 %s785_s6, 4  ;;  %s545_s8 = int_to_ptr.vmem [resolvable:$true] %s544_s8 }
  0x30   :  { %671 = vmatprep.subr.mxu0 %v782_v0  ;;  %s752_s14 = scalar_lea.vmem %s545_s8, 128  ;;  %p757_p11 = scmp.lt.s32.totalorder %s545_s8, %s545_s8 }
  0x31   :  { %672 = vmatpush3.msra.mxu0 %v72_v15  ;;  %v373_v15 = vcombine.high %v371_v12, %v371_v12  ;;  %p753_p10 = scmp.ne.s32.totalorder %s545_s8, %s752_s14  ;;  %p758_p12 = scmp.lt.s32.totalorder %s752_s14, %s752_s14 }
  0x32   :  { %673 = vmatprep.subr.mxu0 %v782_v0 }
  0x33   :  { %674 = vmatpush3.msra.mxu0 %v71_v16  ;;  %v317_v16 = vld [vmem:[#allocation5 + $0x100] sm:$0xff]  ;;  %p759_p13 = por %p758_p12, %p757_p11 }
  0x34   :  { %675 = vmatprep.subr.mxu0 %v782_v0 }
  0x35   :  { %676 = vmatpush3.msra.mxu0 %v70_v19  ;;  %p760_p0 = pnand %p759_p13, %p753_p10 }
  0x36   :  { %677 = vmatprep.subr.mxu0 %v782_v0 }
  0x37   :  { %678 = vmatpush3.msra.mxu0 %v69_v20 }
  0x38   :  { %679 = vmatprep.subr.mxu0 %v782_v0 }
  0x39   :  { %680 = vmatpush3.msra.mxu0 %v68_v22 }
  0x3a   :  { %681 = vmatprep.subr.mxu0 %v782_v0  ;;  %v336_v0 = vld [vmem:[#allocation5 + $0x198] sm:$0xff] }
  0x3b   :  { %682 = vmatpush3.msra.mxu0 %v67_v23  ;;  %v556_v23 = vld [vmem:[%s929_s4] ss:$0 sm:$0xff] }
  0x3c   :  { %684 = vmatmul.mubr.f32.vlgmr.msra.gmra.mxu0 %v66_v24  ;;  %616 = vmatprep.subr.mxu0 %v348_v37  ;;  %v313_v37 = vld [vmem:[#allocation5 + $0xe0] sm:$0xff] }
  0x3d   :  { %617 = vmatpush3.msra.mxu0 %v332_v38  ;;  %512 = vmatprep.mubr.f32.mxu0 %v373_v15  ;;  %v297_v38 = vld [vmem:[#allocation5 + $0x60] sm:$0xff] }
  0x3e   :  { %618 = vmatprep.subr.mxu0 %v347_v39  ;;  %v312_v39 = vld [vmem:[#allocation5 + $0xd8] sm:$0xff] }
  0x3f   :  { %619 = vmatpush3.msra.mxu0 %v331_v40  ;;  %v296_v40 = vld [vmem:[#allocation5 + $0x58] sm:$0xff] }
  0x40   :  { %620 = vmatprep.subr.mxu0 %v346_v41  ;;  %v311_v41 = vld [vmem:[#allocation5 + $0xd0] sm:$0xff] }
  0x41   :  { %621 = vmatpush3.msra.mxu0 %v330_v42  ;;  %v295_v42 = vld [vmem:[#allocation5 + $0x50] sm:$0xff] }
  0x42   :  { %622 = vmatprep.subr.mxu0 %v345_v43  ;;  %v310_v43 = vld [vmem:[#allocation5 + $0xc8] sm:$0xff] }
  0x43   :  { %623 = vmatpush3.msra.mxu0 %v329_v44  ;;  %v294_v44 = vld [vmem:[#allocation5 + $0x48] sm:$0xff] }
  0x44   :  { %624 = vmatprep.subr.mxu0 %v344_v45  ;;  %v309_v45 = vld [vmem:[#allocation5 + $0xc0] sm:$0xff] }
  0x45   :  { %625 = vmatpush3.msra.mxu0 %v328_v46  ;;  %v293_v46 = vld [vmem:[#allocation5 + $0x40] sm:$0xff] }
  0x46   :  { %626 = vmatprep.subr.mxu0 %v343_v47  ;;  %v308_v47 = vld [vmem:[#allocation5 + $0xb8] sm:$0xff] }
  0x47   :  { %627 = vmatpush3.msra.mxu0 %v327_v48  ;;  %v292_v48 = vld [vmem:[#allocation5 + $0x38] sm:$0xff] }
  0x48   :  { %628 = vmatprep.subr.mxu0 %v342_v49  ;;  %v307_v49 = vld [vmem:[#allocation5 + $0xb0] sm:$0xff] }
  0x49   :  { %629 = vmatpush3.msra.mxu0 %v326_v50  ;;  %v291_v50 = vld [vmem:[#allocation5 + $0x30] sm:$0xff] }
  0x4a   :  { %630 = vmatprep.subr.mxu0 %v341_v51  ;;  %v306_v51 = vld [vmem:[#allocation5 + $0xa8] sm:$0xff] }
  0x4b   :  { %631 = vmatpush3.msra.mxu0 %v325_v52  ;;  %v290_v52 = vld [vmem:[#allocation5 + $0x28] sm:$0xff] }
  0x4c   :  { %632 = vmatprep.subr.mxu0 %v340_v53  ;;  %v305_v53 = vld [vmem:[#allocation5 + $0xa0] sm:$0xff] }
  0x4d   :  { %633 = vmatpush3.msra.mxu0 %v324_v54  ;;  %v289_v54 = vld [vmem:[#allocation5 + $0x20] sm:$0xff] }
  0x4e   :  { %634 = vmatprep.subr.mxu0 %v339_v55  ;;  %v304_v55 = vld [vmem:[#allocation5 + $0x98] sm:$0xff] }
  0x4f   :  { %635 = vmatpush3.msra.mxu0 %v323_v56  ;;  %v288_v56 = vld [vmem:[#allocation5 + $0x18] sm:$0xff] }
  0x50   :  { %636 = vmatprep.subr.mxu0 %v338_v57  ;;  %v303_v57 = vld [vmem:[#allocation5 + $0x90] sm:$0xff] }
  0x51   :  { %637 = vmatpush3.msra.mxu0 %v322_v58  ;;  %v287_v58 = vld [vmem:[#allocation5 + $0x10] sm:$0xff] }
  0x52   :  { %638 = vmatprep.subr.mxu0 %v337_v59  ;;  %v302_v59 = vld [vmem:[#allocation5 + $0x88] sm:$0xff] }
  0x53   :  { %639 = vmatpush3.msra.mxu0 %v321_v63 }
  0x54   :  { %640 = vmatprep.subr.mxu0 %v336_v0 }
  0x55   :  { %641 = vmatpush3.msra.mxu0 %v320_v3 }
  0x56   :  { %642 = vmatprep.subr.mxu0 %v335_v5 }
  0x57   :  { %643 = vmatpush3.msra.mxu0 %v319_v8 }
  0x58   :  { %644 = vmatprep.subr.mxu0 %v334_v10 }
  0x59   :  { %645 = vmatpush3.msra.mxu0 %v318_v13 }
  0x5a   :  { %646 = vmatprep.subr.mxu0 %v333_v14 }
  0x5b   :  { %647 = vmatpush3.msra.mxu0 %v317_v16 }
  0x5c   :  { %513 = vmatmul.mubr.f32.vlgmr.msra.gmra.mxu0 %v371_v12 }
  0xfc   :  { %v156_v26 = vpop.f32.mrf.mxu0 }
  0xfd   :  { %v157_v27 = vadd.f32 %v554_v25, %v156_v26 }
  0xfe   :  { %v685_v28 = vpop.f32.mrf.mxu0 }
  0xff   :  { %v161_v29 = vsel %vm160_vm1, %v157_v27, 0.0 }
 0x100   :  { %162 = vadd.xlane.f32.xlu0 %v161_v29 }
 0x11c   :  { %v648_v3 = vpop.f32.mrf.mxu0 }
 0x11e   :  { %v649_v8 = vpop.f32.mrf.mxu0 }
 0x189   :  { %v163_v30 = vpop.xlane.xlu0 %162 }
 0x18a   :  { %v165_v31 = vmul.f32 0.125, %v163_v30  ;;  %v372_v30 = vcombine.high %v903_v11, %v903_v11 }
 0x18c   :  { %v896_v32 = vsub.f32 %v157_v27, %v165_v31 }
 0x18e   :  { %v167_v33 = vmul.f32 %v896_v32, %v896_v32 }
 0x190   :  { %v168_v34 = vsel %vm160_vm1, %v167_v33, 0.0  ;;  %v300_v33 = vld [vmem:[#allocation5 + $0x78] sm:$0xff] }
 0x191   :  { %169 = vadd.xlane.f32.xlu0 %v168_v34  ;;  %v315_v34 = vld [vmem:[#allocation5 + $0xf0] sm:$0xff] }
 0x21a   :  { %v170_v17 = vpop.xlane.xlu0 %169 }
 0x21b   :  { %v171_v18 = vmul.f32 0.125, %v170_v17 }
 0x21d   :  { %v172_v19 = vadd.f32 1e-05, %v171_v18 }
 0x21f   :  { %700 = vrsqrt.f32 %v172_v19 }
 0x22c   :  { %v701_v20 = vpop.eup %700 }
 0x22d   :  { %v174_v22 = vmul.f32 %v701_v20, %v896_v32  ;;  %v299_v32 = vld [vmem:[#allocation5 + $0x70] sm:$0xff] }
 0x22f   :  { %v182_v24 = vmul.f32 %v555_v21, %v174_v22 }
 0x231   :  { %v190_v25 = vadd.f32 %v556_v23, %v182_v24  ;;  %v529_v23 = vld [vmem:[#allocation2 + $0x2] sm:$0x3]  ;;  %v532_v24 = vld [vmem:[#allocation2 + $0x4] sm:$0x3] }
 0x233   :  { %v192_v26 = vmul.f32 0.70710677, %v190_v25  ;;  %v191_v28 = vmul.f32 0.5, %v190_v25  ;;  %v535_v25 = vld [vmem:[#allocation2 + $0x6] sm:$0x3] }
 0x235   :  { %702 = verf.f32 %v192_v26 }
 0x242   :  { %v703_v27 = vpop.eup %702 }
 0x243   :  { %v194_v29 = vadd.f32 1.0, %v703_v27 }
 0x245   :  { %v195_v31 = vmul.f32 %v194_v29, %v191_v28 }
 0x247   :  { %689 = vmatmul.mubr.msk.f32.vlgmr.msra.gmra.mxu1 %vm204_vm2, %v195_v31 }
 0x248   :  { %582 = vmatpush3.msra.mxu1 %v300_v33  ;;  %442 = vmatprep.mubr.f32.mxu1 %v372_v30 }
 0x249   :  { %583 = vmatprep.subr.mxu1 %v315_v34 }
 0x24a   :  { %584 = vmatpush3.msra.mxu1 %v299_v32 }
 0x24b   :  { %585 = vmatprep.subr.mxu1 %v314_v35 }
 0x24c   :  { %586 = vmatpush3.msra.mxu1 %v298_v36 }
 0x24d   :  { %587 = vmatprep.subr.mxu1 %v313_v37 }
 0x24e   :  { %588 = vmatpush3.msra.mxu1 %v297_v38 }
 0x24f   :  { %589 = vmatprep.subr.mxu1 %v312_v39 }
 0x250   :  { %590 = vmatpush3.msra.mxu1 %v296_v40 }
 0x251   :  { %591 = vmatprep.subr.mxu1 %v311_v41 }
 0x252   :  { %592 = vmatpush3.msra.mxu1 %v295_v42 }
 0x253   :  { %593 = vmatprep.subr.mxu1 %v310_v43 }
 0x254   :  { %594 = vmatpush3.msra.mxu1 %v294_v44 }
 0x255   :  { %595 = vmatprep.subr.mxu1 %v309_v45 }
 0x256   :  { %596 = vmatpush3.msra.mxu1 %v293_v46 }
 0x257   :  { %597 = vmatprep.subr.mxu1 %v308_v47 }
 0x258   :  { %598 = vmatpush3.msra.mxu1 %v292_v48 }
 0x259   :  { %599 = vmatprep.subr.mxu1 %v307_v49 }
 0x25a   :  { %600 = vmatpush3.msra.mxu1 %v291_v50 }
 0x25b   :  { %601 = vmatprep.subr.mxu1 %v306_v51 }
 0x25c   :  { %602 = vmatpush3.msra.mxu1 %v290_v52 }
 0x25d   :  { %603 = vmatprep.subr.mxu1 %v305_v53 }
 0x25e   :  { %604 = vmatpush3.msra.mxu1 %v289_v54 }
 0x25f   :  { %605 = vmatprep.subr.mxu1 %v304_v55 }
 0x260   :  { %606 = vmatpush3.msra.mxu1 %v288_v56 }
 0x261   :  { %607 = vmatprep.subr.mxu1 %v303_v57 }
 0x262   :  { %608 = vmatpush3.msra.mxu1 %v287_v58 }
 0x263   :  { %609 = vmatprep.subr.mxu1 %v302_v59 }
 0x264   :  { %610 = vmatpush3.msra.mxu1 %v286_v60 }
 0x265   :  { %611 = vmatprep.subr.mxu1 %v301_v61 }
 0x266   :  { %612 = vmatpush3.msra.mxu1 %v285_v62 }
 0x267   :  { %443 = vmatmul.mubr.f32.vlgmr.msra.gmra.mxu1 %v903_v11  ;;  %v650_v11 = vadd.f32 %v649_v8, %v648_v3 }
 0x307   :  { %v274_v63 = vpop.f32.mrf.mxu1 }
 0x308   :  { %v275_v2 = vadd.f32 %v557_v1, %v274_v63 }
 0x309   :  { %v690_v0 = vpop.f32.mrf.mxu1 }
 0x30a   :  { %v559_v5 = vmul.f32 -1.442695, %v275_v2 }
 0x30c   :  { %704 = vpow2.f32 %v559_v5 }
 0x319   :  { %v705_v15 = vpop.eup %704 }
 0x31a   :  { %v281_v16 = vadd.f32 1.0, %v705_v15 }
 0x327   :  { %v613_v4 = vpop.f32.mrf.mxu1 }
 0x329   :  { %v614_v7 = vpop.f32.mrf.mxu1 }
 0x32a   :  { %v615_v10 = vadd.f32 %v614_v7, %v613_v4 }
 0x32c   :  { %v445_v12 = vadd.f32 %v615_v10, %v560_v6 }
 0x32e   :  { %v515_v13 = vadd.f32 %v650_v11, %v445_v12 }
 0x330   :  { %v561_v14 = vmul.f32 -1.442695, %v515_v13 }
 0x332   :  { %706 = vpow2.f32 %v561_v14 }
 0x333   :  { %708 = vrcp.f32 %v281_v16 }
 0x33f   :  { %v707_v17 = vpop.eup %706 }
 0x340   :  { %v521_v18 = vadd.f32 1.0, %v707_v17  ;;  %v709_v19 = vpop.eup %708 }
 0x341   :  { %v524_v21 = vmul.f32 0.7, %v709_v19 }
 0x342   :  { %710 = vrcp.f32 %v521_v18 }
 0x34f   :  { %v711_v20 = vpop.eup %710 }
 0x350   :  { %v525_v22 = vmul.f32 0.3, %v711_v20 }
 0x352   :  { %v526_v26 = vadd.f32 %v525_v22, %v524_v21 }
 0x354   :  { %v527_v27 = vmul.f32 %v526_v26, %v866_v9  ;;  %v530_v28 = vmul.f32 %v529_v23, %v526_v26  ;;  %v533_v29 = vmul.f32 %v532_v24, %v526_v26  ;;  %v536_v30 = vmul.f32 %v535_v25, %v526_v26 }
 0x356   :  { %528 = vst [vmem:[#allocation7] sm:$0x3] %v527_v27  ;;  %531 = vst [vmem:[#allocation7 + $0x2] sm:$0x3] %v530_v28 }
 0x357   :  { %534 = vst [vmem:[#allocation7 + $0x4] sm:$0x3] %v533_v29  ;;  %537 = vst [vmem:[#allocation7 + $0x6] sm:$0x3] %v536_v30 }
 0x358   :  { %763 = shalt.err (!%p760_p0)
}
 0x359   :  { %547 = dma.vmem_to_hbm [thread:$0]  %s545_s8, 128, %s934_s9, [#allocation4]  }
 0x35a   :  { %776 = dma.done.wait [#allocation4], 128  }
 0x35b   :  { %777 = vsyncadd [#allocation4], 4294967168 }
 0x35c   :  { %551 = vsyncpa [#allocation3], 1 }
 0x35d   :  { %552 = vsyncpa [#allocation6], 1 }
 0x35e   :  { %553 = vsyncpa [#allocation4], 1 }

</bundles_post_ra>
